<compile_context>
chip_gen: v7x
topology: tpu7x:2x2x1
jax: 0.10.0
libtpu: 0.0.40
codegen_flags: <defaults>
</compile_context>

<pallas_src>
import math

import jax
import jax.numpy as jnp
from jax.experimental import pallas as pl
from jax.experimental.pallas import tpu as pltpu


def _cmul_kernel(x_ref, beta_ref, gamma_ref, o_ref):
    # x_ref: (BR, BC); beta_ref / gamma_ref: (1, BC) -> broadcast over rows.
    o_ref[...] = (x_ref[...] + beta_ref[...]) * gamma_ref[...]


def _sublane_multiple(dtype) -> int:
    # Sublane granularity: 8 for 4-byte, 16 for 2-byte, 32 for 1-byte dtypes.
    itemsize = jnp.dtype(dtype).itemsize
    return max(8, 32 // max(itemsize, 1))


def _round_up(x, m):
    return ((x + m - 1) // m) * m


def _tpu_generation():
    """Best-effort TPU generation detection: 'v5e' / 'v6e' / 'v7x' / None."""
    try:
        kind = jax.devices()[0].device_kind.lower()
    except Exception:
        return None
    if "v7" in kind:
        return "v7x"
    if "v6" in kind:
        return "v6e"
    if "v5" in kind and ("lite" in kind or "v5e" in kind):
        return "v5e"
    return None


def _target_tile_bytes(gen):
    # Per live buffer. 4 live x/out buffers stay well under the default scoped VMEM
    # (v5e: 16 MiB, v6e/v7x: 32 MiB); explicit vmem_limit_bytes gives extra headroom.
    if gen in ("v6e", "v7x"):
        return 6 * 1024 * 1024
    return 3 * 1024 * 1024  # v5e or unknown


def _vmem_cap_bytes(gen):
    if gen == "v7x":
        return 48 * 1024 * 1024      # 64 MiB physical per TC
    if gen in ("v5e", "v6e"):
        return 100 * 1024 * 1024     # 128 MiB physical
    return 32 * 1024 * 1024


def _fold_factor(B, F):
    """Fold k batch rows into one so the feature (lane) axis becomes a multiple of
    128 -> lane-dense, unmasked vector stores (largest single measured lever)."""
    if F % 128 == 0:
        return 1
    k = 128 // math.gcd(F, 128)
    if k > 1 and B % k == 0:
        return k
    return 1


def _pick_block_shape(B, F, dtype, target_bytes):
    """Pick (block_rows, block_cols): tile ~target_bytes, sublane/lane aligned."""
    sub = _sublane_multiple(dtype)
    itemsize = jnp.dtype(dtype).itemsize

    # Only tile the feature axis when even a minimum-height full-width row block
    # exceeds the per-buffer budget (very large F) — keeps depth-2 pipelining intact.
    if F <= 128 or F * itemsize * sub <= target_bytes:
        block_cols = F
    else:
        block_cols = max(128, (target_bytes // (sub * itemsize)) // 128 * 128)
        block_cols = min(block_cols, _round_up(F, 128))

    rows = target_bytes // max(block_cols * itemsize, 1)
    rows = max(sub, (rows // sub) * sub)        # sublane-aligned (bytes-based, no row cap)
    rows = min(rows, _round_up(B, sub))         # never exceed (padded) batch
    return int(rows), int(block_cols)


def cmul_pallas(x, beta, gamma, *, block_rows=None, block_cols=None):
    """Elementwise (x + beta) * gamma with beta/gamma broadcast over the batch."""
    B0, F0 = x.shape
    assert beta.shape == (1, F0) and gamma.shape == (1, F0)
    beta = beta.astype(x.dtype)
    gamma = gamma.astype(x.dtype)

    # Lane-dense folding: present a last dim that's a multiple of 128 when possible.
    k = _fold_factor(B0, F0)
    if k > 1:
        x_in = x.reshape(B0 // k, k * F0)
        beta_in = jnp.tile(beta, (1, k))
        gamma_in = jnp.tile(gamma, (1, k))
    else:
        x_in, beta_in, gamma_in = x, beta, gamma
    B, F = x_in.shape

    gen = _tpu_generation()
    target = _target_tile_bytes(gen)
    br_auto, bc_auto = _pick_block_shape(B, F, x.dtype, target)
    br = int(block_rows) if block_rows is not None else br_auto
    bc = int(block_cols) if block_cols is not None else bc_auto

    itemsize = jnp.dtype(x.dtype).itemsize
    grid = (pl.cdiv(B, br), pl.cdiv(F, bc))  # ragged tiles: OOB reads padded, writes dropped

    # Explicit VMEM budget: x + out tiles double-buffered + tiny beta/gamma + headroom.
    tile_bytes = br * bc * itemsize
    param_bytes = 2 * 2 * 8 * bc * itemsize
    need = 4 * tile_bytes + param_bytes
    vmem_limit = int(min(max(2 * need + (4 << 20), 16 << 20), _vmem_cap_bytes(gen)))

    # Megacore: on v7x actually shard the batch grid axis across the 2 TensorCores.
    row_sem = pltpu.PARALLEL
    if gen == "v7x" and grid[0] >= 2:
        row_sem = pltpu.CORE_PARALLEL

    cost = pl.CostEstimate(
        flops=2 * B * F,
        transcendentals=0,
        bytes_accessed=(2 * B * F + 2 * F) * itemsize,
    )

    out = pl.pallas_call(
        _cmul_kernel,
        out_shape=jax.ShapeDtypeStruct((B, F), x.dtype),
        grid=grid,
        in_specs=[
            # x: tiled over batch (and features only when F is huge) -> pipelined DMA.
            pl.BlockSpec((br, bc), lambda i, j: (i, j)),
            # beta / gamma: block index constant along the fast (feature==1 typically)
            # axis -> fetched once and resident in VMEM in the common single-col case.
            pl.BlockSpec((1, bc), lambda i, j: (0, j)),
            pl.BlockSpec((1, bc), lambda i, j: (0, j)),
        ],
        out_specs=pl.BlockSpec((br, bc), lambda i, j: (i, j)),
        compiler_params=pltpu.CompilerParams(
            dimension_semantics=(row_sem, pltpu.ARBITRARY),
            vmem_limit_bytes=vmem_limit,
        ),
        cost_estimate=cost,
    )(x_in, beta_in, gamma_in)

    if k > 1:
        out = out.reshape(B0, F0)
    return out


def cmul(x, beta, gamma, *, min_elements_for_kernel=1 << 16, force_kernel=False):
    """CMul forward. For tiny inputs a pallas_call launch costs more than the math,
    so fall back to a plain XLA fusion below a size threshold."""
    if not force_kernel and x.size < min_elements_for_kernel:
        return (x + beta) * gamma
    return cmul_pallas(x, beta, gamma)


if __name__ == "__main__":
    key = jax.random.PRNGKey(0)
    k_x, k_b, k_g, k_x2, k_b2, k_g2, k_x3, k_b3, k_g3 = jax.random.split(key, 9)

    # --- Small demo at module-spec shapes (batch=2, tensor_size=32). ---
    batch, tensor_size = 2, 32
    x = jax.random.normal(k_x, (batch, tensor_size), dtype=jnp.float32)
    beta = jax.random.normal(k_b, (1, tensor_size), dtype=jnp.float32)
    gamma = jax.random.normal(k_g, (1, tensor_size), dtype=jnp.float32)

    out = cmul(x, beta, gamma, force_kernel=True)  # force the Pallas path for the test
    out = jax.block_until_ready(out)
    ref = (x + beta) * gamma
    assert out.shape == x.shape
    assert jnp.allclose(out, ref, atol=1e-6, rtol=1e-6)

    # --- Larger check: multi-MiB tile, ragged batch, lane-dense F multiple of 128. ---
    B2, F2 = 3000, 256
    x2 = jax.random.normal(k_x2, (B2, F2), dtype=jnp.float32)
    beta2 = jax.random.normal(k_b2, (1, F2), dtype=jnp.float32)
    gamma2 = jax.random.normal(k_g2, (1, F2), dtype=jnp.float32)
    out2 = jax.block_until_ready(cmul_pallas(x2, beta2, gamma2))
    ref2 = (x2 + beta2) * gamma2
    assert jnp.allclose(out2, ref2, atol=1e-6, rtol=1e-6)

    # --- Exercise the 2-D (feature-tiled) grid path with forced small blocks. ---
    out2b = jax.block_until_ready(
        cmul_pallas(x2, beta2, gamma2, block_rows=512, block_cols=128))
    assert jnp.allclose(out2b, ref2, atol=1e-6, rtol=1e-6)

    # --- Exercise lane-dense folding: F=96 (not a multiple of 128), B divisible by 4. ---
    B3, F3 = 512, 96
    x3 = jax.random.normal(k_x3, (B3, F3), dtype=jnp.float32)
    beta3 = jax.random.normal(k_b3, (1, F3), dtype=jnp.float32)
    gamma3 = jax.random.normal(k_g3, (1, F3), dtype=jnp.float32)
    out3 = jax.block_until_ready(cmul_pallas(x3, beta3, gamma3))
    ref3 = (x3 + beta3) * gamma3
    assert out3.shape == (B3, F3)
    assert jnp.allclose(out3, ref3, atol=1e-6, rtol=1e-6)

    print("KERNEL_OK")
</pallas_src>

<mosaic_0001>
module attributes {stable_mosaic.version = 11 : i64} {
  func.func @_cmul_kernel(%arg0: i32, %arg1: i32, %arg2: memref<8x32xf32, #tpu.memory_space<vmem>>, %arg3: memref<1x32xf32, #tpu.memory_space<vmem>>, %arg4: memref<1x32xf32, #tpu.memory_space<vmem>>, %arg5: memref<8x32xf32, #tpu.memory_space<vmem>>) attributes {dimension_semantics = [#tpu.dimension_semantics<parallel>, #tpu.dimension_semantics<arbitrary>], iteration_bounds = array<i64: 1, 1>, scalar_prefetch = 0 : i64, scratch_operands = 0 : i64, tpu.core_type = #tpu.core_type<tc>, window_params = [{transform_indices = @transform_0, window_bounds = array<i64: 8, 32>}, {transform_indices = @transform_1, window_bounds = array<i64: 1, 32>}, {transform_indices = @transform_2, window_bounds = array<i64: 1, 32>}, {transform_indices = @transform_3, window_bounds = array<i64: 8, 32>}]} {
    %c0 = arith.constant 0 : index
    %c0_0 = arith.constant 0 : index
    %0 = vector.load %arg2[%c0, %c0_0] : memref<8x32xf32, #tpu.memory_space<vmem>>, vector<8x32xf32>
    %c0_1 = arith.constant 0 : index
    %c0_2 = arith.constant 0 : index
    %1 = vector.load %arg3[%c0_1, %c0_2] : memref<1x32xf32, #tpu.memory_space<vmem>>, vector<1x32xf32>
    %2 = vector.broadcast %1 : vector<1x32xf32> to vector<8x32xf32>
    %3 = arith.addf %0, %2 : vector<8x32xf32>
    %c0_3 = arith.constant 0 : index
    %c0_4 = arith.constant 0 : index
    %4 = vector.load %arg4[%c0_3, %c0_4] : memref<1x32xf32, #tpu.memory_space<vmem>>, vector<1x32xf32>
    %5 = vector.broadcast %4 : vector<1x32xf32> to vector<8x32xf32>
    %6 = arith.mulf %3, %5 : vector<8x32xf32>
    %c0_5 = arith.constant 0 : index
    %c0_6 = arith.constant 0 : index
    %7 = vector.load %arg5[%c0_5, %c0_6] : memref<8x32xf32, #tpu.memory_space<vmem>>, vector<8x32xf32>
    tpu.vector_store %arg5[%c0_5, %c0_6], %6 {strides = array<i32>} : memref<8x32xf32, #tpu.memory_space<vmem>>, vector<8x32xf32>,
    return
  }
  func.func @transform_0(%arg0: i32, %arg1: i32) -> (i32, i32) {
    %c0_i32 = arith.constant 0 : i32
    return %arg0, %arg1 : i32, i32
  }
  func.func @transform_1(%arg0: i32, %arg1: i32) -> (i32, i32) {
    %c0_i32 = arith.constant 0 : i32
    %c0_i32_0 = arith.constant 0 : i32
    return %c0_i32, %arg1 : i32, i32
  }
  func.func @transform_2(%arg0: i32, %arg1: i32) -> (i32, i32) {
    %c0_i32 = arith.constant 0 : i32
    %c0_i32_0 = arith.constant 0 : i32
    return %c0_i32, %arg1 : i32, i32
  }
  func.func @transform_3(%arg0: i32, %arg1: i32) -> (i32, i32) {
    %c0_i32 = arith.constant 0 : i32
    return %arg0, %arg1 : i32, i32
  }
}

</mosaic_0001>

<bundles_post_ra>
// kernel: tpu_custom_call.1
= control target key start
LH: loop header
LB: loop body
LE: loop exit
PB: predicated region body
PF: predicated region fallthrough
CT: control target
= control target key end

     0   :  { %8 = vsyncpa [#allocation3], 0  ;;  %s179_s0 = inlined_call_operand.hbm [shape: f32[2,32], index: 0, kind: input, shape index: {}]   ;;  %s180_s1 = inlined_call_operand.vmem [shape: f32[1,32], index: 1, kind: input, shape index: {}]   ;;  %s181_s2 = inlined_call_operand.vmem [shape: f32[1,32], index: 2, kind: input, shape index: {}]   ;;  %s182_s3 = inlined_call_operand.hbm [shape: f32[2,32], index: 3, kind: output, shape index: {}]  }
   0x1   :  { %9 = vsyncpa [#allocation4], 0 }
   0x2   :  { %14 = vsyncadd [#allocation3], 96  ;;  %s119_s12 = smov [#allocation2]   ;;  %s71_s16 = scalar_lea.hbm %s179_s0, 32 }
   0x3   :  { %s15_s13 = sshll.u32 %s119_s12, 4  ;;  %p72_p0 = scmp.ne.s32.totalorder %s179_s0, %s71_s16  ;;  %s16_s13 = int_to_ptr.vmem [resolvable:$true] %s15_s13 }
   0x4   :  { %p75_p1 = scmp.lt.u32.totalorder %s71_s16, %s179_s0 }
   0x6   :  { %p77_p2 = pnand %p75_p1, %p72_p0 }
   0x8   :  { %80 = shalt.err (!%p77_p2)
}
   0x9   :  { %s81_s21 = scalar_lea.vmem %s16_s13, 32  ;;  %s85_s22 = scalar_lea.vmem %s16_s13, 128 }
   0xa   :  { %p82_p3 = scmp.ne.s32.totalorder %s16_s13, %s81_s21  ;;  %p86_p4 = scmp.lt.s32.totalorder %s16_s13, %s16_s13 }
   0xb   :  { %p87_p5 = scmp.lt.s32.totalorder %s85_s22, %s81_s21 }
   0xd   :  { %p88_p6 = por %p87_p5, %p86_p4 }
   0xf   :  { %p89_p7 = pnand %p88_p6, %p82_p3 }
  0x11   :  { %92 = shalt.err (!%p89_p7)
}
  0x12   :  { %s120_s23 = smov 32   ;;  %s121_s24 = smov 2  }
  0x13   :  { %21 = dma.hbm_to_vmem [thread:$0]  %s179_s0, 32, %s16_s13, [#allocation3], %s120_s23, %s120_s23, %s121_s24  }
  0x14   :  { %115 = dma.done.wait [#allocation3], 128  }
  0x15   :  { %116 = vsyncadd [#allocation3], 4294967168  ;;  %v29_v0 = vld [vmem:[#allocation2] sm:$0xff]  ;;  %vm46_vm0 = vcmask 261120  }
  0x16   :  { %v65_v1 = vld [vmem:[%s180_s1] ss:$0 sm:$0xff] }
  0x17   :  { %v66_v2 = vld [vmem:[%s181_s2] ss:$0 sm:$0xff]  ;;  %v37_v3 = vadd.f32 %v65_v1, %v29_v0 }
  0x19   :  { %v45_v4 = vmul.f32 %v66_v2, %v37_v3 }
  0x1b   :  { %47 = vst.msk [vmem:[#allocation5] sm:$0xff] %vm46_vm0, %v45_v4 }
  0x1c   :  { %52 = vsyncadd [#allocation4], 96  ;;  %s122_s4 = smov [#allocation5]  }
  0x1d   :  { %s53_s5 = sshll.u32 %s122_s4, 4  ;;  %s54_s5 = int_to_ptr.vmem [resolvable:$true] %s53_s5 }
  0x1e   :  { %s93_s0 = scalar_lea.vmem %s54_s5, 32  ;;  %s97_s6 = scalar_lea.vmem %s54_s5, 128 }
  0x1f   :  { %p94_p8 = scmp.ne.s32.totalorder %s54_s5, %s93_s0  ;;  %p98_p9 = scmp.lt.s32.totalorder %s54_s5, %s54_s5 }
  0x20   :  { %p99_p10 = scmp.lt.s32.totalorder %s97_s6, %s93_s0 }
  0x22   :  { %p100_p11 = por %p99_p10, %p98_p9 }
  0x24   :  { %p101_p12 = pnand %p100_p11, %p94_p8 }
  0x26   :  { %104 = shalt.err (!%p101_p12)
}
  0x27   :  { %s105_s2 = scalar_lea.hbm %s182_s3, 32 }
  0x28   :  { %p106_p13 = scmp.ne.s32.totalorder %s182_s3, %s105_s2  ;;  %p109_p0 = scmp.lt.u32.totalorder %s105_s2, %s182_s3 }
  0x2a   :  { %p111_p1 = pnand %p109_p0, %p106_p13 }
  0x2c   :  { %114 = shalt.err (!%p111_p1)
}
  0x2d   :  { %59 = dma.vmem_to_hbm [thread:$0]  %s54_s5, 32, %s182_s3, [#allocation4], %s120_s23, %s120_s23, %s121_s24  }
  0x2e   :  { %117 = dma.done.wait [#allocation4], 128  }
  0x2f   :  { %118 = vsyncadd [#allocation4], 4294967168 }
  0x30   :  { %63 = vsyncpa [#allocation3], 1 }
  0x31   :  { %64 = vsyncpa [#allocation4], 1 }

</bundles_post_ra>
